<compile_context>
chip_gen: v7x
topology: tpu7x:2x2x1
jax: 0.10.0
libtpu: 0.0.40
codegen_flags: <defaults>
</compile_context>

<pallas_src>
import itertools

import numpy as np
import jax
import jax.numpy as jnp
from jax.experimental import pallas as pl
from jax.experimental.pallas import tpu as pltpu

IN_CH, OUT_CH = 4, 8
KSIZE, DIM = 3, 3
STRIDE = 2                  # deconv (transposed conv) stride
KVOL = KSIZE ** DIM         # 27 kernel offsets
BN_EPS = 1e-5
TM_MAX = 2048               # output points per grid step (sweepable 2048-8192 for huge clouds)
TM_ALIGN = 512


def _round_up(x, m):
    return (x + m - 1) // m * m


def _pick_tm(n_out):
    """Big tile to amortize per-step overhead, clamped so small clouds keep >=2 grid steps."""
    half = _round_up(max(1, -(-n_out // 2)), TM_ALIGN)
    return max(TM_ALIGN, min(TM_MAX, half))


def deconv_bn_relu_kernel(x_ref, w_ref, shift_ref, o_ref):
    # x_ref:     (TM, KCpad)   bf16 — gathered neighborhood features (row-major, no transpose)
    # w_ref:     (KCpad, Cout) bf16 — transposed-conv weights with BN scale folded in (resident)
    # shift_ref: (1, Cout)     f32  — folded BN shift = beta - mean * gamma / sqrt(var+eps)
    # o_ref:     (TM, Cout)    f32
    acc = jnp.dot(x_ref[...], w_ref[...], preferred_element_type=jnp.float32)
    o_ref[...] = jnp.maximum(acc + shift_ref[...], 0.0).astype(o_ref.dtype)


def _pallas_deconv_bn_relu(x, w, shift_row, tm):
    n_pad, kc_pad = x.shape
    cout = w.shape[1]
    grid = (n_pad // tm,)
    cost = pl.CostEstimate(
        flops=2 * n_pad * kc_pad * cout,
        transcendentals=0,
        bytes_accessed=(x.size * x.dtype.itemsize
                        + w.size * w.dtype.itemsize
                        + shift_row.size * 4
                        + n_pad * cout * 4),
    )
    return pl.pallas_call(
        deconv_bn_relu_kernel,
        out_shape=jax.ShapeDtypeStruct((n_pad, cout), jnp.float32),
        grid_spec=pltpu.PrefetchScalarGridSpec(
            num_scalar_prefetch=0,
            grid=grid,
            in_specs=[
                pl.BlockSpec((tm, kc_pad), lambda i: (i, 0)),     # gathered feature slab
                pl.BlockSpec((kc_pad, cout), lambda i: (0, 0)),   # weights (resident)
                pl.BlockSpec((1, cout), lambda i: (0, 0)),        # BN shift
            ],
            out_specs=pl.BlockSpec((tm, cout), lambda i: (i, 0)),
        ),
        compiler_params=pltpu.CompilerParams(dimension_semantics=("parallel",)),
        cost_estimate=cost,
    )(x, w, shift_row)


def _fold_bn(W, gamma, beta, running_mean, running_var):
    """Fold eval-mode BatchNorm into the conv weights (scale) and a per-channel shift."""
    inv_std = 1.0 / jnp.sqrt(running_var.astype(jnp.float32) + BN_EPS)
    scale = gamma.astype(jnp.float32) * inv_std
    shift = beta.astype(jnp.float32) - running_mean.astype(jnp.float32) * scale
    w_scaled = W.astype(jnp.float32) * scale[None, None, :]       # (K, Cin, Cout)
    return w_scaled, shift


def mink_deconv_bn_relu_forward(in_feats, nbr_idx, nbr_mask, W, gamma, beta,
                                running_mean, running_var):
    """Forward pass of MinkDeConvBNRelu on a sparse tensor.

    in_feats:   (N_in, Cin)   float32 input point features (tensor stride = STRIDE)
    nbr_idx:    (N_out, K)    int32 transposed-conv kernel map: index of the input point
                              contributing to output i via kernel offset k, or -1
    nbr_mask:   (N_out, K)    bool, nbr_idx >= 0
    W:          (K, Cin, Cout) transposed-conv weights (bias=False)
    Returns (N_out, Cout) float32 output features (BN eval mode + ReLU applied).
    """
    n_out, kvol = nbr_idx.shape
    cin = in_feats.shape[1]
    cout = W.shape[2]
    kc = kvol * cin
    kc_pad = _round_up(kc, 16)            # bf16 sublane packing is 16 rows
    tm = _pick_tm(n_out)
    n_pad = _round_up(n_out, tm)

    # --- glue: fold BN scale into weights, keep shift separate ---
    w_scaled, shift = _fold_bn(W, gamma, beta, running_mean, running_var)
    w_flat = w_scaled.reshape(kc, cout)
    w_flat = jnp.pad(w_flat, ((0, kc_pad - kc), (0, 0))).astype(jnp.bfloat16)   # (KCpad, Cout)
    shift_row = shift.reshape(1, cout)                                          # (1, Cout) f32

    # --- glue: gather neighborhood features in bf16, padding pushed into the index arrays ---
    feats_bf = in_feats.astype(jnp.bfloat16)
    if kc_pad % cin == 0:
        # pad kernel volume instead of the feature slab -> slab produced at final shape, one pass
        kvol_pad = kc_pad // cin
        idx = jnp.pad(nbr_idx, ((0, n_pad - n_out), (0, kvol_pad - kvol)), constant_values=-1)
        msk = jnp.pad(nbr_mask, ((0, n_pad - n_out), (0, kvol_pad - kvol)), constant_values=False)
        gath = jnp.where(msk[..., None], feats_bf[jnp.maximum(idx, 0)], 0)   # (N_pad, Kp, Cin) bf16
        x = gath.reshape(n_pad, kc_pad)                                       # contiguous (free) reshape
    else:
        idx = jnp.pad(nbr_idx, ((0, n_pad - n_out), (0, 0)), constant_values=-1)
        msk = jnp.pad(nbr_mask, ((0, n_pad - n_out), (0, 0)), constant_values=False)
        gath = jnp.where(msk[..., None], feats_bf[jnp.maximum(idx, 0)], 0)
        x = jnp.pad(gath.reshape(n_pad, kc), ((0, 0), (0, kc_pad - kc)))

    out = _pallas_deconv_bn_relu(x, w_flat, shift_row, tm)                    # (N_pad, Cout) f32
    return out[:n_out]                                                        # (N_out, Cout) f32


if __name__ == "__main__":
    key = jax.random.PRNGKey(0)
    k_c0, k_c1, k_feat, k_w, k_g, k_b, k_m, k_v = jax.random.split(key, 8)

    # --- synthetic sparse input at tensor stride 2: unique voxel coords, batch of 2 ---
    GRID = 6                      # 6 cells per axis at stride 2 -> coords in {0,2,...,10}
    pts_per_batch = 40
    in_coords_list = []
    for b, kk in enumerate([k_c0, k_c1]):
        flat = np.asarray(jax.random.permutation(kk, GRID ** 3)[:pts_per_batch])
        xyz = np.stack(np.unravel_index(flat, (GRID,) * 3), axis=-1).astype(np.int32) * STRIDE
        bcol = np.full((pts_per_batch, 1), b, dtype=np.int32)
        in_coords_list.append(np.concatenate([bcol, xyz], axis=-1))
    in_coords = np.concatenate(in_coords_list, axis=0)   # (N_in, 4) = (batch, x, y, z)
    N_in = in_coords.shape[0]                            # 80 input points

    feats = jax.random.normal(k_feat, (N_in, IN_CH), dtype=jnp.float32)

    # --- deterministic synthetic parameters (module __init__ shapes, bias=False) ---
    W = 0.1 * jax.random.normal(k_w, (KVOL, IN_CH, OUT_CH), dtype=jnp.float32)
    gamma = 1.0 + 0.1 * jax.random.normal(k_g, (OUT_CH,), dtype=jnp.float32)
    beta = 0.1 * jax.random.normal(k_b, (OUT_CH,), dtype=jnp.float32)
    running_mean = 0.1 * jax.random.normal(k_m, (OUT_CH,), dtype=jnp.float32)
    running_var = jnp.abs(jax.random.normal(k_v, (OUT_CH,), dtype=jnp.float32)) + 0.5

    # --- host glue: generative transposed-conv output coords + kernel map ---
    # output tensor stride = STRIDE // STRIDE = 1; kernel offsets {-1,0,1}^3 (lexicographic)
    offsets = np.array(list(itertools.product([-1, 0, 1], repeat=3)), dtype=np.int32)
    in_lut = {tuple(int(v) for v in c): i for i, c in enumerate(in_coords)}

    out_set = {}
    for i in range(N_in):
        b, x, y, z = (int(v) for v in in_coords[i])
        for k in range(KVOL):
            c = (b, x + int(offsets[k, 0]), y + int(offsets[k, 1]), z + int(offsets[k, 2]))
            if c not in out_set:
                out_set[c] = len(out_set)
    out_coords = np.array(sorted(out_set.keys()), dtype=np.int32)
    N_out = out_coords.shape[0]

    # kernel map: out[u] += in[u - o_k] @ W[k]   (missing contributor -> -1)
    nbr = np.full((N_out, KVOL), -1, dtype=np.int32)
    for i in range(N_out):
        b, x, y, z = (int(v) for v in out_coords[i])
        for k in range(KVOL):
            nbr[i, k] = in_lut.get(
                (b, x - int(offsets[k, 0]), y - int(offsets[k, 1]), z - int(offsets[k, 2])), -1)
    nbr = jnp.asarray(nbr)
    mask = nbr >= 0

    out = mink_deconv_bn_relu_forward(feats, nbr, mask, W, gamma, beta,
                                      running_mean, running_var)
    out = jax.block_until_ready(out)

    # --- pure-JAX reference (same bf16 operand quantization, f32 accumulation) ---
    w_scaled, shift = _fold_bn(W, gamma, beta, running_mean, running_var)
    gath_ref = jnp.where(mask[..., None],
                         feats.astype(jnp.bfloat16)[jnp.maximum(nbr, 0)], 0)
    conv_ref = jnp.einsum(
        "nkc,kco->no",
        gath_ref.astype(jnp.float32),
        w_scaled.astype(jnp.bfloat16).astype(jnp.float32))
    ref = jnp.maximum(conv_ref + shift[None, :], 0.0)

    assert out.shape == (N_out, OUT_CH) and out.dtype == jnp.float32
    np.testing.assert_allclose(np.asarray(out), np.asarray(ref), rtol=1e-4, atol=1e-4)
    print("KERNEL_OK")
</pallas_src>

<mosaic_0001>
module attributes {stable_mosaic.version = 11 : i64} {
  func.func @deconv_bn_relu_kernel(%arg0: i32, %arg1: memref<1024x112xbf16, #tpu.memory_space<vmem>>, %arg2: memref<112x8xbf16, #tpu.memory_space<vmem>>, %arg3: memref<1x8xf32, #tpu.memory_space<vmem>>, %arg4: memref<1024x8xf32, #tpu.memory_space<vmem>>) attributes {dimension_semantics = [#tpu.dimension_semantics<parallel>], iteration_bounds = array<i64: 2>, scalar_prefetch = 0 : i64, scratch_operands = 0 : i64, tpu.core_type = #tpu.core_type<tc>, window_params = [{transform_indices = @transform_0, window_bounds = array<i64: 1024, 112>}, {pipeline_mode = #tpu.pipeline_mode<synchronous>, transform_indices = @transform_1, window_bounds = array<i64: 112, 8>}, {pipeline_mode = #tpu.pipeline_mode<synchronous>, transform_indices = @transform_2, window_bounds = array<i64: 1, 8>}, {transform_indices = @transform_3, window_bounds = array<i64: 1024, 8>}]} {
    %c0 = arith.constant 0 : index
    %c0_0 = arith.constant 0 : index
    %0 = vector.load %arg1[%c0, %c0_0] : memref<1024x112xbf16, #tpu.memory_space<vmem>>, vector<1024x112xbf16>
    %c0_1 = arith.constant 0 : index
    %c0_2 = arith.constant 0 : index
    %1 = vector.load %arg2[%c0_1, %c0_2] : memref<112x8xbf16, #tpu.memory_space<vmem>>, vector<112x8xbf16>
    %cst = arith.constant dense<0.000000e+00> : vector<1024x8xf32>
    %2 = tpu.matmul %0, %1, %cst {dimension_numbers = #tpu.dot_dimension_numbers<[1], [0], [0], [1], [0, 0, 1, 1], [], []>} : vector<1024x112xbf16>, vector<112x8xbf16>, vector<1024x8xf32> -> vector<1024x8xf32>
    %c0_3 = arith.constant 0 : index
    %c0_4 = arith.constant 0 : index
    %3 = vector.load %arg3[%c0_3, %c0_4] : memref<1x8xf32, #tpu.memory_space<vmem>>, vector<1x8xf32>
    %4 = vector.broadcast %3 : vector<1x8xf32> to vector<1024x8xf32>
    %5 = arith.addf %2, %4 : vector<1024x8xf32>
    %cst_5 = arith.constant 0.000000e+00 : f32
    %6 = vector.broadcast %cst_5 : f32 to vector<1024x8xf32>
    %7 = arith.maximumf %5, %6 : vector<1024x8xf32>
    %c0_6 = arith.constant 0 : index
    %c0_7 = arith.constant 0 : index
    %8 = vector.load %arg4[%c0_6, %c0_7] : memref<1024x8xf32, #tpu.memory_space<vmem>>, vector<1024x8xf32>
    tpu.vector_store %arg4[%c0_6, %c0_7], %7 {strides = array<i32>} : memref<1024x8xf32, #tpu.memory_space<vmem>>, vector<1024x8xf32>,
    return
  }
  func.func @transform_0(%arg0: i32) -> (i32, i32) {
    %c0_i32 = arith.constant 0 : i32
    %c0_i32_0 = arith.constant 0 : i32
    return %arg0, %c0_i32 : i32, i32
  }
  func.func @transform_1(%arg0: i32) -> (i32, i32) {
    %c0_i32 = arith.constant 0 : i32
    %c0_i32_0 = arith.constant 0 : i32
    %c0_i32_1 = arith.constant 0 : i32
    return %c0_i32, %c0_i32_0 : i32, i32
  }
  func.func @transform_2(%arg0: i32) -> (i32, i32) {
    %c0_i32 = arith.constant 0 : i32
    %c0_i32_0 = arith.constant 0 : i32
    %c0_i32_1 = arith.constant 0 : i32
    return %c0_i32, %c0_i32_0 : i32, i32
  }
  func.func @transform_3(%arg0: i32) -> (i32, i32) {
    %c0_i32 = arith.constant 0 : i32
    %c0_i32_0 = arith.constant 0 : i32
    return %arg0, %c0_i32 : i32, i32
  }
}

</mosaic_0001>

<bundles_post_ra>
// kernel: tpu_custom_call.1
= control target key start
LH: loop header
LB: loop body
LE: loop exit
PB: predicated region body
PF: predicated region fallthrough
CT: control target
= control target key end

     0   :  { %s2218_s12 = smov 0   ;;  %s2781_s0 = inlined_call_operand.vmem [shape: bf16[2048,112], index: 0, kind: input, shape index: {}]   ;;  %s2782_s1 = inlined_call_operand.vmem [shape: bf16[112,8], index: 1, kind: input, shape index: {}]   ;;  %s2783_s2 = inlined_call_operand.vmem [shape: f32[1,8], index: 2, kind: input, shape index: {}]   ;;  %s2784_s3 = inlined_call_operand.vmem [shape: f32[2048,8], index: 3, kind: output, shape index: {}]  }
   0x1 LB: > { %s1737_s13 = sadd.s32 4294967295, %s2196_s12   ;;  %p1741_p0 = scmp.ge.s32.totalorder %s2196_s12, 1  ;;  %s2196_s12 = sphi %s2218_s12, %s13_s12  }
   0x2   : > { %p138_p1 = scmp.lt.s32.totalorder %s2196_s12, 3 }
   0x4   : > { %p139_p2 = pnand %p1741_p0, %p138_p1 }
   0x5   : > { %v2119_v0 = vld [vmem:[%s2782_s1] sm:$0xff] (!%p139_p2)   ;;  %s1742_s16 = sshll.u32 (!%p139_p2), %s1737_s13, 7  ;;  %v2120_v1 = vld [vmem:[%s2782_s1 + $0x8] sm:$0xff] (!%p139_p2)   ;;  %v2121_v2 = vld [vmem:[%s2782_s1 + $0x10] sm:$0xff] (!%p139_p2)   ;;  %vm686_vm0 = vcmask (!%p139_p2), 916480   ;;  %vm1552_vm1 = vcmask (!%p139_p2), 64512  }
   0x6   : > { %142 = sbr.rel (%p139_p2) target bundleno = 374 (0x176), region = 32  ;;  %p163_p3 = scmp.lt.s32.totalorder (!%p139_p2), %s1742_s16, 255  ;;  %1955 = vmatprep.subr.bf16.mxu0 (!%p139_p2), %v2119_v0  ;;  %2097 = vmatprep.subr.bf16.mxu1 (!%p139_p2), %v2119_v0  ;;  %v2122_v3 = vld [vmem:[%s2782_s1 + $0x18] sm:$0xff] (!%p139_p2)   ;;  %v2123_v6 = vld [vmem:[%s2782_s1 + $0x20] sm:$0xff] (!%p139_p2)   ;;  %v2124_v7 = vld [vmem:[%s2782_s1 + $0x28] sm:$0xff] (!%p139_p2)  }
   0x7   : > { %1956 = vmatpush3.bf16.msra.mxu0 (!%p139_p2), %v2119_v0  ;;  %2104 = vmatpush3.bf16.msra.mxu1 (!%p139_p2), %v2119_v0  ;;  %v2125_v8 = vld [vmem:[%s2782_s1 + $0x30] sm:$0xff] (!%p139_p2)  }
   0x8   : > { %1957 = vmatprep.subr.bf16.mxu0 (!%p139_p2), %v2120_v1  ;;  %2098 = vmatprep.subr.bf16.mxu1 (!%p139_p2), %v2120_v1 }
   0xb   : > { %1958 = vmatpush3.bf16.msra.mxu0 (!%p139_p2), %v2120_v1  ;;  %2105 = vmatpush3.bf16.msra.mxu1 (!%p139_p2), %v2120_v1 }
   0xc   : > { %1959 = vmatprep.subr.bf16.mxu0 (!%p139_p2), %v2121_v2  ;;  %2099 = vmatprep.subr.bf16.mxu1 (!%p139_p2), %v2121_v2 }
   0xd   : > { %s2786_s16 = smov (!%p163_p3, %s1742_s16), 255 }
   0xe   : > { %s1743_s21 = sshll.u32 %s2786_s16, 2  ;;  %s1745_s8 = sshll.u32 %s2786_s16, 3 }
   0xf   : > { %s2244_s26 = scalar_lea.vmem %s2781_s0, %s1743_s21  ;;  %1960 = vmatpush3.bf16.msra.mxu0 %v2121_v2  ;;  %2106 = vmatpush3.bf16.msra.mxu1 %v2121_v2  ;;  %s2394_s11 = scalar_lea.vmem %s2784_s3, %s1745_s8 }
  0x10   : > { %v2126_v4 = vld [vmem:[%s2244_s26] sm:$0xff]   ;;  %1961 = vmatprep.subr.bf16.mxu0 %v2122_v3  ;;  %2100 = vmatprep.subr.bf16.mxu1 %v2122_v3  ;;  %v2128_v9 = vld [vmem:[%s2244_s26 + $0x8] sm:$0xff]   ;;  %v2130_v11 = vld [vmem:[%s2244_s26 + $0x10] sm:$0xff]  }
  0x11   : > { %v2127_v5 = vld [vmem:[%s2244_s26 + $0x100] sm:$0xff]   ;;  %1969 = vmatprep.mubr.msk.bf16.mxu0 %vm686_vm0, %v2126_v4  ;;  %v2129_v10 = vld [vmem:[%s2244_s26 + $0x108] sm:$0xff]   ;;  %v2131_v12 = vld [vmem:[%s2244_s26 + $0x110] sm:$0xff]  }
  0x12   : > { %2033 = vmatprep.mubr.msk.bf16.mxu1 %vm686_vm0, %v2127_v5  ;;  %v2132_v13 = vld [vmem:[%s2244_s26 + $0x18] sm:$0xff]   ;;  %v2134_v15 = vld [vmem:[%s2244_s26 + $0x20] sm:$0xff]   ;;  %v2136_v17 = vld [vmem:[%s2244_s26 + $0x28] sm:$0xff]  }
  0x13   : > { %1962 = vmatpush3.bf16.msra.mxu0 %v2122_v3  ;;  %2107 = vmatpush3.bf16.msra.mxu1 %v2122_v3  ;;  %v2133_v14 = vld [vmem:[%s2244_s26 + $0x118] sm:$0xff]   ;;  %v2135_v16 = vld [vmem:[%s2244_s26 + $0x120] sm:$0xff]   ;;  %v2137_v18 = vld [vmem:[%s2244_s26 + $0x128] sm:$0xff]  }
  0x14   : > { %1963 = vmatprep.subr.bf16.mxu0 %v2123_v6  ;;  %2101 = vmatprep.subr.bf16.mxu1 %v2123_v6  ;;  %v2138_v19 = vld [vmem:[%s2244_s26 + $0x30] sm:$0xff]   ;;  %v2140_v21 = vld [vmem:[%s2244_s26 + $0x38] sm:$0xff]   ;;  %v2142_v23 = vld [vmem:[%s2244_s26 + $0x40] sm:$0xff]  }
  0x15   : > { %v2139_v20 = vld [vmem:[%s2244_s26 + $0x130] sm:$0xff]   ;;  %v2141_v22 = vld [vmem:[%s2244_s26 + $0x138] sm:$0xff]   ;;  %v2143_v24 = vld [vmem:[%s2244_s26 + $0x140] sm:$0xff]  }
  0x16   : > { %v2144_v25 = vld [vmem:[%s2244_s26 + $0x48] sm:$0xff]   ;;  %v2146_v27 = vld [vmem:[%s2244_s26 + $0x50] sm:$0xff]   ;;  %v2148_v29 = vld [vmem:[%s2244_s26 + $0x58] sm:$0xff]  }
  0x17   : > { %1964 = vmatpush3.bf16.msra.mxu0 %v2123_v6  ;;  %2108 = vmatpush3.bf16.msra.mxu1 %v2123_v6  ;;  %v2145_v26 = vld [vmem:[%s2244_s26 + $0x148] sm:$0xff]   ;;  %v2147_v28 = vld [vmem:[%s2244_s26 + $0x150] sm:$0xff]   ;;  %v2149_v30 = vld [vmem:[%s2244_s26 + $0x158] sm:$0xff]  }
  0x18   : > { %1965 = vmatprep.subr.bf16.mxu0 %v2124_v7  ;;  %2102 = vmatprep.subr.bf16.mxu1 %v2124_v7  ;;  %v2150_v31 = vld [vmem:[%s2244_s26 + $0x60] sm:$0xff]   ;;  %v2152_v33 = vld [vmem:[%s2244_s26 + $0x68] sm:$0xff]   ;;  %v2154_v35 = vld [vmem:[%s2244_s26 + $0x70] sm:$0xff]  }
  0x19   : > { %v2151_v32 = vld [vmem:[%s2244_s26 + $0x160] sm:$0xff]   ;;  %v2153_v34 = vld [vmem:[%s2244_s26 + $0x168] sm:$0xff]   ;;  %v2155_v36 = vld [vmem:[%s2244_s26 + $0x170] sm:$0xff]  }
  0x1a   : > { %v2156_v37 = vld [vmem:[%s2244_s26 + $0x78] sm:$0xff]   ;;  %v2158_v39 = vld [vmem:[%s2244_s26 + $0x80] sm:$0xff]   ;;  %v2160_v41 = vld [vmem:[%s2244_s26 + $0x88] sm:$0xff]  }
  0x1b   : > { %1966 = vmatpush3.bf16.msra.mxu0 %v2124_v7  ;;  %2109 = vmatpush3.bf16.msra.mxu1 %v2124_v7  ;;  %v2157_v38 = vld [vmem:[%s2244_s26 + $0x178] sm:$0xff]   ;;  %v2159_v40 = vld [vmem:[%s2244_s26 + $0x180] sm:$0xff]   ;;  %v2161_v42 = vld [vmem:[%s2244_s26 + $0x188] sm:$0xff]  }
  0x1c   : > { %1967 = vmatprep.subr.bf16.mxu0 %v2125_v8  ;;  %2103 = vmatprep.subr.bf16.mxu1 %v2125_v8  ;;  %v2162_v43 = vld [vmem:[%s2244_s26 + $0x90] sm:$0xff]   ;;  %v2164_v45 = vld [vmem:[%s2244_s26 + $0x98] sm:$0xff]   ;;  %v2166_v47 = vld [vmem:[%s2244_s26 + $0xa0] sm:$0xff]  }
  0x1d   : > { %v2163_v44 = vld [vmem:[%s2244_s26 + $0x190] sm:$0xff]   ;;  %v2165_v46 = vld [vmem:[%s2244_s26 + $0x198] sm:$0xff]   ;;  %v2167_v48 = vld [vmem:[%s2244_s26 + $0x1a0] sm:$0xff]  }
  0x1e   : > { %v2168_v49 = vld [vmem:[%s2244_s26 + $0xa8] sm:$0xff]   ;;  %v2170_v51 = vld [vmem:[%s2244_s26 + $0xb0] sm:$0xff]   ;;  %v2172_v53 = vld [vmem:[%s2244_s26 + $0xb8] sm:$0xff]  }
  0x1f   : > { %1968 = vmatpush3.bf16.msra.mxu0 %v2125_v8  ;;  %2110 = vmatpush3.bf16.msra.mxu1 %v2125_v8  ;;  %v2169_v50 = vld [vmem:[%s2244_s26 + $0x1a8] sm:$0xff]   ;;  %v2171_v52 = vld [vmem:[%s2244_s26 + $0x1b0] sm:$0xff]   ;;  %v2173_v54 = vld [vmem:[%s2244_s26 + $0x1b8] sm:$0xff]  }
  0x20   : > { %v2174_v55 = vld [vmem:[%s2244_s26 + $0xc0] sm:$0xff]   ;;  %v2176_v57 = vld [vmem:[%s2244_s26 + $0xc8] sm:$0xff]   ;;  %v2178_v59 = vld [vmem:[%s2244_s26 + $0xd0] sm:$0xff]  }
  0x21   : > { %v2175_v56 = vld [vmem:[%s2244_s26 + $0x1c0] sm:$0xff]   ;;  %v2177_v58 = vld [vmem:[%s2244_s26 + $0x1c8] sm:$0xff]   ;;  %v2179_v60 = vld [vmem:[%s2244_s26 + $0x1d0] sm:$0xff]  }
  0x22   : > { %1970 = vmatmul.mubr.msk.bf16.vlgmr.msra.gmra.mrb[0].mxu0 %vm686_vm0, %v2128_v9  ;;  %2034 = vmatmul.mubr.msk.bf16.vlgmr.msra.gmra.mrb[0].mxu1 %vm686_vm0, %v2129_v10  ;;  %v2180_v61 = vld [vmem:[%s2244_s26 + $0xd8] sm:$0xff]   ;;  %v2182_v63 = vld [vmem:[%s2244_s26 + $0xe0] sm:$0xff]   ;;  %v2184_v1 = vld [vmem:[%s2244_s26 + $0xe8] sm:$0xff]  }
  0x23   : > { %1973 = vmatprep.mubr.msk.bf16.mxu0 %vm686_vm0, %v2130_v11  ;;  %2037 = vmatprep.mubr.msk.bf16.mxu1 %vm686_vm0, %v2131_v12  ;;  %v2181_v62 = vld [vmem:[%s2244_s26 + $0x1d8] sm:$0xff]   ;;  %v2183_v0 = vld [vmem:[%s2244_s26 + $0x1e0] sm:$0xff]   ;;  %v2185_v2 = vld [vmem:[%s2244_s26 + $0x1e8] sm:$0xff]  }
  0x24   : > { %v2186_v3 = vld [vmem:[%s2244_s26 + $0xf0] sm:$0xff]   ;;  %v2188_v5 = vld [vmem:[%s2244_s26 + $0xf8] sm:$0xff]   ;;  %v2386_v7 = vld [vmem:[%s2783_s2] ss:$0 sm:$0xff] }
  0x25   : > { %v2187_v4 = vld [vmem:[%s2244_s26 + $0x1f0] sm:$0xff]   ;;  %v2189_v6 = vld [vmem:[%s2244_s26 + $0x1f8] sm:$0xff]  }
  0x2a   : > { %1974 = vmatmul.mubr.msk.bf16.gmra.mrb[4].mxu0 %vm686_vm0, %v2132_v13  ;;  %2038 = vmatmul.mubr.msk.bf16.gmra.mrb[4].mxu1 %vm686_vm0, %v2133_v14 }
  0x2b   : > { %1977 = vmatprep.mubr.msk.bf16.mxu0 %vm686_vm0, %v2134_v15  ;;  %2041 = vmatprep.mubr.msk.bf16.mxu1 %vm686_vm0, %v2135_v16 }
  0x32   : > { %1978 = vmatmul.mubr.msk.bf16.gmra.mrb[8].mxu0 %vm686_vm0, %v2136_v17  ;;  %2042 = vmatmul.mubr.msk.bf16.gmra.mrb[8].mxu1 %vm686_vm0, %v2137_v18 }
  0x33   : > { %1981 = vmatprep.mubr.msk.bf16.mxu0 %vm686_vm0, %v2138_v19  ;;  %2045 = vmatprep.mubr.msk.bf16.mxu1 %vm686_vm0, %v2139_v20 }
  0x3a   : > { %1982 = vmatmul.mubr.msk.bf16.gmra.mrb[12].mxu0 %vm686_vm0, %v2140_v21  ;;  %2046 = vmatmul.mubr.msk.bf16.gmra.mrb[12].mxu1 %vm686_vm0, %v2141_v22 }
  0x3b   : > { %1985 = vmatprep.mubr.msk.bf16.mxu0 %vm686_vm0, %v2142_v23  ;;  %2049 = vmatprep.mubr.msk.bf16.mxu1 %vm686_vm0, %v2143_v24 }
  0x42   : > { %1986 = vmatmul.mubr.msk.bf16.gmra.mrb[16].mxu0 %vm686_vm0, %v2144_v25  ;;  %2050 = vmatmul.mubr.msk.bf16.gmra.mrb[16].mxu1 %vm686_vm0, %v2145_v26 }
  0x43   : > { %1989 = vmatprep.mubr.msk.bf16.mxu0 %vm686_vm0, %v2146_v27  ;;  %2053 = vmatprep.mubr.msk.bf16.mxu1 %vm686_vm0, %v2147_v28 }
  0x4a   : > { %1990 = vmatmul.mubr.msk.bf16.gmra.mrb[20].mxu0 %vm686_vm0, %v2148_v29  ;;  %2054 = vmatmul.mubr.msk.bf16.gmra.mrb[20].mxu1 %vm686_vm0, %v2149_v30 }
  0x4b   : > { %1993 = vmatprep.mubr.msk.bf16.mxu0 %vm686_vm0, %v2150_v31  ;;  %2057 = vmatprep.mubr.msk.bf16.mxu1 %vm686_vm0, %v2151_v32 }
  0x52   : > { %1994 = vmatmul.mubr.msk.bf16.gmra.mrb[24].mxu0 %vm686_vm0, %v2152_v33  ;;  %2058 = vmatmul.mubr.msk.bf16.gmra.mrb[24].mxu1 %vm686_vm0, %v2153_v34 }
  0x53   : > { %1997 = vmatprep.mubr.msk.bf16.mxu0 %vm686_vm0, %v2154_v35  ;;  %2061 = vmatprep.mubr.msk.bf16.mxu1 %vm686_vm0, %v2155_v36 }
  0x5a   : > { %1998 = vmatmul.mubr.msk.bf16.gmra.mrb[28].mxu0 %vm686_vm0, %v2156_v37  ;;  %2062 = vmatmul.mubr.msk.bf16.gmra.mrb[28].mxu1 %vm686_vm0, %v2157_v38 }
  0x5b   : > { %2001 = vmatprep.mubr.msk.bf16.mxu0 %vm686_vm0, %v2158_v39  ;;  %2065 = vmatprep.mubr.msk.bf16.mxu1 %vm686_vm0, %v2159_v40 }
  0x62   : > { %2002 = vmatmul.mubr.msk.bf16.gmra.mrb[32].mxu0 %vm686_vm0, %v2160_v41  ;;  %2066 = vmatmul.mubr.msk.bf16.gmra.mrb[32].mxu1 %vm686_vm0, %v2161_v42 }
  0x63   : > { %2005 = vmatprep.mubr.msk.bf16.mxu0 %vm686_vm0, %v2162_v43  ;;  %2069 = vmatprep.mubr.msk.bf16.mxu1 %vm686_vm0, %v2163_v44 }
  0x6a   : > { %2006 = vmatmul.mubr.msk.bf16.gmra.mrb[36].mxu0 %vm686_vm0, %v2164_v45  ;;  %2070 = vmatmul.mubr.msk.bf16.gmra.mrb[36].mxu1 %vm686_vm0, %v2165_v46 }
  0x6b   : > { %2009 = vmatprep.mubr.msk.bf16.mxu0 %vm686_vm0, %v2166_v47  ;;  %2073 = vmatprep.mubr.msk.bf16.mxu1 %vm686_vm0, %v2167_v48 }
  0x72   : > { %2010 = vmatmul.mubr.msk.bf16.gmra.mrb[40].mxu0 %vm686_vm0, %v2168_v49  ;;  %2074 = vmatmul.mubr.msk.bf16.gmra.mrb[40].mxu1 %vm686_vm0, %v2169_v50 }
  0x73   : > { %2013 = vmatprep.mubr.msk.bf16.mxu0 %vm686_vm0, %v2170_v51  ;;  %2077 = vmatprep.mubr.msk.bf16.mxu1 %vm686_vm0, %v2171_v52 }
  0x7a   : > { %2014 = vmatmul.mubr.msk.bf16.gmra.mrb[44].mxu0 %vm686_vm0, %v2172_v53  ;;  %2078 = vmatmul.mubr.msk.bf16.gmra.mrb[44].mxu1 %vm686_vm0, %v2173_v54 }
  0x7b   : > { %2017 = vmatprep.mubr.msk.bf16.mxu0 %vm686_vm0, %v2174_v55  ;;  %2081 = vmatprep.mubr.msk.bf16.mxu1 %vm686_vm0, %v2175_v56 }
  0x82   : > { %2018 = vmatmul.mubr.msk.bf16.gmra.mrb[48].mxu0 %vm686_vm0, %v2176_v57  ;;  %2082 = vmatmul.mubr.msk.bf16.gmra.mrb[48].mxu1 %vm686_vm0, %v2177_v58 }
  0x83   : > { %2021 = vmatprep.mubr.msk.bf16.mxu0 %vm686_vm0, %v2178_v59  ;;  %2085 = vmatprep.mubr.msk.bf16.mxu1 %vm686_vm0, %v2179_v60 }
  0x8a   : > { %2022 = vmatmul.mubr.msk.bf16.gmra.mrb[52].mxu0 %vm686_vm0, %v2180_v61  ;;  %2086 = vmatmul.mubr.msk.bf16.gmra.mrb[52].mxu1 %vm686_vm0, %v2181_v62 }
  0x8b   : > { %2025 = vmatprep.mubr.msk.bf16.mxu0 %vm686_vm0, %v2182_v63  ;;  %2089 = vmatprep.mubr.msk.bf16.mxu1 %vm686_vm0, %v2183_v0 }
  0x92   : > { %2026 = vmatmul.mubr.msk.bf16.gmra.mrb[56].mxu0 %vm686_vm0, %v2184_v1  ;;  %2090 = vmatmul.mubr.msk.bf16.gmra.mrb[56].mxu1 %vm686_vm0, %v2185_v2 }
  0x93   : > { %2029 = vmatprep.mubr.msk.bf16.mxu0 %vm686_vm0, %v2186_v3  ;;  %2093 = vmatprep.mubr.msk.bf16.mxu1 %vm686_vm0, %v2187_v4 }
  0x9a   : > { %2030 = vmatmul.mubr.msk.bf16.gmra.mrb[60].mxu0 %vm686_vm0, %v2188_v5  ;;  %2094 = vmatmul.mubr.msk.bf16.gmra.mrb[60].mxu1 %vm686_vm0, %v2189_v6 }
  0xf5   : > { %v1971_v8 = vpop.f32.mrb[0].mxu0  ;;  %v2035_v9 = vpop.f32.mrb[0].mxu1 }
  0xf6   : > { %v922_v10 = vadd.f32 %v1971_v8, %v2386_v7  ;;  %v1178_v11 = vadd.f32 %v2035_v9, %v2386_v7  ;;  %v913_v12 = vpop.f32.mrb[1].mxu0  ;;  %v1169_v13 = vpop.f32.mrb[1].mxu1 }
  0xf7   : > { %v914_v14 = vadd.f32 %v2386_v7, %v913_v12  ;;  %v1170_v15 = vadd.f32 %v2386_v7, %v1169_v13  ;;  %v1972_v16 = vpop.f32.mrb[2].mxu0  ;;  %v2036_v17 = vpop.f32.mrb[2].mxu1 }
  0xf8   : > { %v1426_v18 = vmax.f32 %v922_v10, 0.0  ;;  %v1490_v19 = vmax.f32 %v1178_v11, 0.0  ;;  %v925_v20 = vadd.f32 %v1972_v16, %v2386_v7  ;;  %v1181_v21 = vadd.f32 %v2036_v17, %v2386_v7  ;;  %v916_v22 = vpop.f32.mrb[3].mxu0  ;;  %v1172_v23 = vpop.f32.mrb[3].mxu1 }
  0xf9   : > { %v1424_v24 = vmax.f32 %v914_v14, 0.0  ;;  %v1488_v25 = vmax.f32 %v1170_v15, 0.0  ;;  %v917_v26 = vadd.f32 %v2386_v7, %v916_v22  ;;  %v1173_v27 = vadd.f32 %v2386_v7, %v1172_v23 }
  0xfa   : > { %1555 = vst.msk [vmem:[%s2394_s11 + $0x10] sm:$0xff] %vm1552_vm1, %v1426_v18  ;;  %1619 = vst.msk [vmem:[%s2394_s11 + $0x210] sm:$0xff] %vm1552_vm1, %v1490_v19  ;;  %v1427_v28 = vmax.f32 %v925_v20, 0.0  ;;  %v1491_v29 = vmax.f32 %v1181_v21, 0.0 }
  0xfb   : > { %1553 = vst.msk [vmem:[%s2394_s11] sm:$0xff] %vm1552_vm1, %v1424_v24  ;;  %1617 = vst.msk [vmem:[%s2394_s11 + $0x200] sm:$0xff] %vm1552_vm1, %v1488_v25  ;;  %v1425_v30 = vmax.f32 %v917_v26, 0.0  ;;  %v1489_v31 = vmax.f32 %v1173_v27, 0.0 }
  0xfc   : > { %1556 = vst.msk [vmem:[%s2394_s11 + $0x18] sm:$0xff] %vm1552_vm1, %v1427_v28  ;;  %1620 = vst.msk [vmem:[%s2394_s11 + $0x218] sm:$0xff] %vm1552_vm1, %v1491_v29 }
  0xfd   : > { %1554 = vst.msk [vmem:[%s2394_s11 + $0x8] sm:$0xff] %vm1552_vm1, %v1425_v30  ;;  %1618 = vst.msk [vmem:[%s2394_s11 + $0x208] sm:$0xff] %vm1552_vm1, %v1489_v31  ;;  %v1975_v32 = vpop.f32.mrb[4].mxu0  ;;  %v2039_v33 = vpop.f32.mrb[4].mxu1 }
  0xfe   : > { %v938_v34 = vadd.f32 %v1975_v32, %v2386_v7  ;;  %v1194_v35 = vadd.f32 %v2039_v33, %v2386_v7  ;;  %v929_v36 = vpop.f32.mrb[5].mxu0  ;;  %v1185_v37 = vpop.f32.mrb[5].mxu1 }
  0xff   : > { %v930_v38 = vadd.f32 %v2386_v7, %v929_v36  ;;  %v1186_v39 = vadd.f32 %v2386_v7, %v1185_v37  ;;  %v1976_v40 = vpop.f32.mrb[6].mxu0  ;;  %v2040_v41 = vpop.f32.mrb[6].mxu1 }
 0x100   : > { %v1430_v42 = vmax.f32 %v938_v34, 0.0  ;;  %v1494_v43 = vmax.f32 %v1194_v35, 0.0  ;;  %v941_v44 = vadd.f32 %v1976_v40, %v2386_v7  ;;  %v1197_v45 = vadd.f32 %v2040_v41, %v2386_v7  ;;  %v932_v46 = vpop.f32.mrb[7].mxu0  ;;  %v1188_v47 = vpop.f32.mrb[7].mxu1 }
 0x101   : > { %v1428_v48 = vmax.f32 %v930_v38, 0.0  ;;  %v1492_v49 = vmax.f32 %v1186_v39, 0.0  ;;  %v933_v50 = vadd.f32 %v2386_v7, %v932_v46  ;;  %v1189_v51 = vadd.f32 %v2386_v7, %v1188_v47 }
 0x102   : > { %1559 = vst.msk [vmem:[%s2394_s11 + $0x30] sm:$0xff] %vm1552_vm1, %v1430_v42  ;;  %1623 = vst.msk [vmem:[%s2394_s11 + $0x230] sm:$0xff] %vm1552_vm1, %v1494_v43  ;;  %v1431_v52 = vmax.f32 %v941_v44, 0.0  ;;  %v1495_v53 = vmax.f32 %v1197_v45, 0.0 }
 0x103   : > { %1557 = vst.msk [vmem:[%s2394_s11 + $0x20] sm:$0xff] %vm1552_vm1, %v1428_v48  ;;  %1621 = vst.msk [vmem:[%s2394_s11 + $0x220] sm:$0xff] %vm1552_vm1, %v1492_v49  ;;  %v1429_v54 = vmax.f32 %v933_v50, 0.0  ;;  %v1493_v55 = vmax.f32 %v1189_v51, 0.0 }
 0x104   : > { %1560 = vst.msk [vmem:[%s2394_s11 + $0x38] sm:$0xff] %vm1552_vm1, %v1431_v52  ;;  %1624 = vst.msk [vmem:[%s2394_s11 + $0x238] sm:$0xff] %vm1552_vm1, %v1495_v53 }
 0x105   : > { %1558 = vst.msk [vmem:[%s2394_s11 + $0x28] sm:$0xff] %vm1552_vm1, %v1429_v54  ;;  %1622 = vst.msk [vmem:[%s2394_s11 + $0x228] sm:$0xff] %vm1552_vm1, %v1493_v55  ;;  %v1979_v56 = vpop.f32.mrb[8].mxu0  ;;  %v2043_v57 = vpop.f32.mrb[8].mxu1 }
 0x106   : > { %v954_v58 = vadd.f32 %v1979_v56, %v2386_v7  ;;  %v1210_v59 = vadd.f32 %v2043_v57, %v2386_v7  ;;  %v945_v60 = vpop.f32.mrb[9].mxu0  ;;  %v1201_v61 = vpop.f32.mrb[9].mxu1 }
 0x107   : > { %v946_v62 = vadd.f32 %v2386_v7, %v945_v60  ;;  %v1202_v63 = vadd.f32 %v2386_v7, %v1201_v61  ;;  %v1980_v0 = vpop.f32.mrb[10].mxu0  ;;  %v2044_v1 = vpop.f32.mrb[10].mxu1 }
 0x108   : > { %v1434_v2 = vmax.f32 %v954_v58, 0.0  ;;  %v1498_v3 = vmax.f32 %v1210_v59, 0.0  ;;  %v957_v4 = vadd.f32 %v1980_v0, %v2386_v7  ;;  %v1213_v5 = vadd.f32 %v2044_v1, %v2386_v7  ;;  %v948_v6 = vpop.f32.mrb[11].mxu0  ;;  %v1204_v8 = vpop.f32.mrb[11].mxu1 }
 0x109   : > { %v1432_v9 = vmax.f32 %v946_v62, 0.0  ;;  %v1496_v10 = vmax.f32 %v1202_v63, 0.0  ;;  %v949_v11 = vadd.f32 %v2386_v7, %v948_v6  ;;  %v1205_v12 = vadd.f32 %v2386_v7, %v1204_v8 }
 0x10a   : > { %1563 = vst.msk [vmem:[%s2394_s11 + $0x50] sm:$0xff] %vm1552_vm1, %v1434_v2  ;;  %1627 = vst.msk [vmem:[%s2394_s11 + $0x250] sm:$0xff] %vm1552_vm1, %v1498_v3  ;;  %v1435_v13 = vmax.f32 %v957_v4, 0.0  ;;  %v1499_v14 = vmax.f32 %v1213_v5, 0.0 }
 0x10b   : > { %1561 = vst.msk [vmem:[%s2394_s11 + $0x40] sm:$0xff] %vm1552_vm1, %v1432_v9  ;;  %1625 = vst.msk [vmem:[%s2394_s11 + $0x240] sm:$0xff] %vm1552_vm1, %v1496_v10  ;;  %v1433_v15 = vmax.f32 %v949_v11, 0.0  ;;  %v1497_v16 = vmax.f32 %v1205_v12, 0.0 }
 0x10c   : > { %1564 = vst.msk [vmem:[%s2394_s11 + $0x58] sm:$0xff] %vm1552_vm1, %v1435_v13  ;;  %1628 = vst.msk [vmem:[%s2394_s11 + $0x258] sm:$0xff] %vm1552_vm1, %v1499_v14 }
 0x10d   : > { %1562 = vst.msk [vmem:[%s2394_s11 + $0x48] sm:$0xff] %vm1552_vm1, %v1433_v15  ;;  %1626 = vst.msk [vmem:[%s2394_s11 + $0x248] sm:$0xff] %vm1552_vm1, %v1497_v16  ;;  %v1983_v17 = vpop.f32.mrb[12].mxu0  ;;  %v2047_v18 = vpop.f32.mrb[12].mxu1 }
 0x10e   : > { %v970_v19 = vadd.f32 %v1983_v17, %v2386_v7  ;;  %v1226_v20 = vadd.f32 %v2047_v18, %v2386_v7  ;;  %v961_v21 = vpop.f32.mrb[13].mxu0  ;;  %v1217_v22 = vpop.f32.mrb[13].mxu1 }
 0x10f   : > { %v962_v23 = vadd.f32 %v2386_v7, %v961_v21  ;;  %v1218_v24 = vadd.f32 %v2386_v7, %v1217_v22  ;;  %v1984_v25 = vpop.f32.mrb[14].mxu0  ;;  %v2048_v26 = vpop.f32.mrb[14].mxu1 }
 0x110   : > { %v1438_v27 = vmax.f32 %v970_v19, 0.0  ;;  %v1502_v28 = vmax.f32 %v1226_v20, 0.0  ;;  %v973_v29 = vadd.f32 %v1984_v25, %v2386_v7  ;;  %v1229_v30 = vadd.f32 %v2048_v26, %v2386_v7  ;;  %v964_v31 = vpop.f32.mrb[15].mxu0  ;;  %v1220_v32 = vpop.f32.mrb[15].mxu1 }
 0x111   : > { %v1436_v33 = vmax.f32 %v962_v23, 0.0  ;;  %v1500_v34 = vmax.f32 %v1218_v24, 0.0  ;;  %v965_v35 = vadd.f32 %v2386_v7, %v964_v31  ;;  %v1221_v36 = vadd.f32 %v2386_v7, %v1220_v32 }
 0x112   : > { %1567 = vst.msk [vmem:[%s2394_s11 + $0x70] sm:$0xff] %vm1552_vm1, %v1438_v27  ;;  %1631 = vst.msk [vmem:[%s2394_s11 + $0x270] sm:$0xff] %vm1552_vm1, %v1502_v28  ;;  %v1439_v37 = vmax.f32 %v973_v29, 0.0  ;;  %v1503_v38 = vmax.f32 %v1229_v30, 0.0 }
 0x113   : > { %1565 = vst.msk [vmem:[%s2394_s11 + $0x60] sm:$0xff] %vm1552_vm1, %v1436_v33  ;;  %1629 = vst.msk [vmem:[%s2394_s11 + $0x260] sm:$0xff] %vm1552_vm1, %v1500_v34  ;;  %v1437_v39 = vmax.f32 %v965_v35, 0.0  ;;  %v1501_v40 = vmax.f32 %v1221_v36, 0.0 }
 0x114   : > { %1568 = vst.msk [vmem:[%s2394_s11 + $0x78] sm:$0xff] %vm1552_vm1, %v1439_v37  ;;  %1632 = vst.msk [vmem:[%s2394_s11 + $0x278] sm:$0xff] %vm1552_vm1, %v1503_v38 }
 0x115   : > { %1566 = vst.msk [vmem:[%s2394_s11 + $0x68] sm:$0xff] %vm1552_vm1, %v1437_v39  ;;  %1630 = vst.msk [vmem:[%s2394_s11 + $0x268] sm:$0xff] %vm1552_vm1, %v1501_v40  ;;  %v1987_v41 = vpop.f32.mrb[16].mxu0  ;;  %v2051_v42 = vpop.f32.mrb[16].mxu1 }
 0x116   : > { %v986_v43 = vadd.f32 %v1987_v41, %v2386_v7  ;;  %v1242_v44 = vadd.f32 %v2051_v42, %v2386_v7  ;;  %v977_v45 = vpop.f32.mrb[17].mxu0  ;;  %v1233_v46 = vpop.f32.mrb[17].mxu1 }
 0x117   : > { %v978_v47 = vadd.f32 %v2386_v7, %v977_v45  ;;  %v1234_v48 = vadd.f32 %v2386_v7, %v1233_v46  ;;  %v1988_v49 = vpop.f32.mrb[18].mxu0  ;;  %v2052_v50 = vpop.f32.mrb[18].mxu1 }
 0x118   : > { %v1442_v51 = vmax.f32 %v986_v43, 0.0  ;;  %v1506_v52 = vmax.f32 %v1242_v44, 0.0  ;;  %v989_v53 = vadd.f32 %v1988_v49, %v2386_v7  ;;  %v1245_v54 = vadd.f32 %v2052_v50, %v2386_v7  ;;  %v980_v55 = vpop.f32.mrb[19].mxu0  ;;  %v1236_v56 = vpop.f32.mrb[19].mxu1 }
 0x119   : > { %v1440_v57 = vmax.f32 %v978_v47, 0.0  ;;  %v1504_v58 = vmax.f32 %v1234_v48, 0.0  ;;  %v981_v59 = vadd.f32 %v2386_v7, %v980_v55  ;;  %v1237_v60 = vadd.f32 %v2386_v7, %v1236_v56 }
 0x11a   : > { %1571 = vst.msk [vmem:[%s2394_s11 + $0x90] sm:$0xff] %vm1552_vm1, %v1442_v51  ;;  %1635 = vst.msk [vmem:[%s2394_s11 + $0x290] sm:$0xff] %vm1552_vm1, %v1506_v52  ;;  %v1443_v61 = vmax.f32 %v989_v53, 0.0  ;;  %v1507_v62 = vmax.f32 %v1245_v54, 0.0 }
 0x11b   : > { %1569 = vst.msk [vmem:[%s2394_s11 + $0x80] sm:$0xff] %vm1552_vm1, %v1440_v57  ;;  %1633 = vst.msk [vmem:[%s2394_s11 + $0x280] sm:$0xff] %vm1552_vm1, %v1504_v58  ;;  %v1441_v63 = vmax.f32 %v981_v59, 0.0  ;;  %v1505_v0 = vmax.f32 %v1237_v60, 0.0 }
 0x11c   : > { %1572 = vst.msk [vmem:[%s2394_s11 + $0x98] sm:$0xff] %vm1552_vm1, %v1443_v61  ;;  %1636 = vst.msk [vmem:[%s2394_s11 + $0x298] sm:$0xff] %vm1552_vm1, %v1507_v62 }
 0x11d   : > { %1570 = vst.msk [vmem:[%s2394_s11 + $0x88] sm:$0xff] %vm1552_vm1, %v1441_v63  ;;  %1634 = vst.msk [vmem:[%s2394_s11 + $0x288] sm:$0xff] %vm1552_vm1, %v1505_v0  ;;  %v1991_v1 = vpop.f32.mrb[20].mxu0  ;;  %v2055_v2 = vpop.f32.mrb[20].mxu1 }
 0x11e   : > { %v1002_v3 = vadd.f32 %v1991_v1, %v2386_v7  ;;  %v1258_v4 = vadd.f32 %v2055_v2, %v2386_v7  ;;  %v993_v5 = vpop.f32.mrb[21].mxu0  ;;  %v1249_v6 = vpop.f32.mrb[21].mxu1 }
 0x11f   : > { %v994_v8 = vadd.f32 %v2386_v7, %v993_v5  ;;  %v1250_v9 = vadd.f32 %v2386_v7, %v1249_v6  ;;  %v1992_v10 = vpop.f32.mrb[22].mxu0  ;;  %v2056_v11 = vpop.f32.mrb[22].mxu1 }
 0x120   : > { %v1446_v12 = vmax.f32 %v1002_v3, 0.0  ;;  %v1510_v13 = vmax.f32 %v1258_v4, 0.0  ;;  %v1005_v14 = vadd.f32 %v1992_v10, %v2386_v7  ;;  %v1261_v15 = vadd.f32 %v2056_v11, %v2386_v7  ;;  %v996_v16 = vpop.f32.mrb[23].mxu0  ;;  %v1252_v17 = vpop.f32.mrb[23].mxu1 }
 0x121   : > { %v1444_v18 = vmax.f32 %v994_v8, 0.0  ;;  %v1508_v19 = vmax.f32 %v1250_v9, 0.0  ;;  %v997_v20 = vadd.f32 %v2386_v7, %v996_v16  ;;  %v1253_v21 = vadd.f32 %v2386_v7, %v1252_v17 }
 0x122   : > { %1575 = vst.msk [vmem:[%s2394_s11 + $0xb0] sm:$0xff] %vm1552_vm1, %v1446_v12  ;;  %1639 = vst.msk [vmem:[%s2394_s11 + $0x2b0] sm:$0xff] %vm1552_vm1, %v1510_v13  ;;  %v1447_v22 = vmax.f32 %v1005_v14, 0.0  ;;  %v1511_v23 = vmax.f32 %v1261_v15, 0.0 }
 0x123   : > { %1573 = vst.msk [vmem:[%s2394_s11 + $0xa0] sm:$0xff] %vm1552_vm1, %v1444_v18  ;;  %1637 = vst.msk [vmem:[%s2394_s11 + $0x2a0] sm:$0xff] %vm1552_vm1, %v1508_v19  ;;  %v1445_v24 = vmax.f32 %v997_v20, 0.0  ;;  %v1509_v25 = vmax.f32 %v1253_v21, 0.0 }
 0x124   : > { %1576 = vst.msk [vmem:[%s2394_s11 + $0xb8] sm:$0xff] %vm1552_vm1, %v1447_v22  ;;  %1640 = vst.msk [vmem:[%s2394_s11 + $0x2b8] sm:$0xff] %vm1552_vm1, %v1511_v23 }
 0x125   : > { %1574 = vst.msk [vmem:[%s2394_s11 + $0xa8] sm:$0xff] %vm1552_vm1, %v1445_v24  ;;  %1638 = vst.msk [vmem:[%s2394_s11 + $0x2a8] sm:$0xff] %vm1552_vm1, %v1509_v25  ;;  %v1995_v26 = vpop.f32.mrb[24].mxu0  ;;  %v2059_v27 = vpop.f32.mrb[24].mxu1 }
 0x126   : > { %v1018_v28 = vadd.f32 %v1995_v26, %v2386_v7  ;;  %v1274_v29 = vadd.f32 %v2059_v27, %v2386_v7  ;;  %v1009_v30 = vpop.f32.mrb[25].mxu0  ;;  %v1265_v31 = vpop.f32.mrb[25].mxu1 }
 0x127   : > { %v1010_v32 = vadd.f32 %v2386_v7, %v1009_v30  ;;  %v1266_v33 = vadd.f32 %v2386_v7, %v1265_v31  ;;  %v1996_v34 = vpop.f32.mrb[26].mxu0  ;;  %v2060_v35 = vpop.f32.mrb[26].mxu1 }
 0x128   : > { %v1450_v36 = vmax.f32 %v1018_v28, 0.0  ;;  %v1514_v37 = vmax.f32 %v1274_v29, 0.0  ;;  %v1021_v38 = vadd.f32 %v1996_v34, %v2386_v7  ;;  %v1277_v39 = vadd.f32 %v2060_v35, %v2386_v7  ;;  %v1012_v40 = vpop.f32.mrb[27].mxu0  ;;  %v1268_v41 = vpop.f32.mrb[27].mxu1 }
 0x129   : > { %v1448_v42 = vmax.f32 %v1010_v32, 0.0  ;;  %v1512_v43 = vmax.f32 %v1266_v33, 0.0  ;;  %v1013_v44 = vadd.f32 %v2386_v7, %v1012_v40  ;;  %v1269_v45 = vadd.f32 %v2386_v7, %v1268_v41 }
 0x12a   : > { %1579 = vst.msk [vmem:[%s2394_s11 + $0xd0] sm:$0xff] %vm1552_vm1, %v1450_v36  ;;  %1643 = vst.msk [vmem:[%s2394_s11 + $0x2d0] sm:$0xff] %vm1552_vm1, %v1514_v37  ;;  %v1451_v46 = vmax.f32 %v1021_v38, 0.0  ;;  %v1515_v47 = vmax.f32 %v1277_v39, 0.0 }
 0x12b   : > { %1577 = vst.msk [vmem:[%s2394_s11 + $0xc0] sm:$0xff] %vm1552_vm1, %v1448_v42  ;;  %1641 = vst.msk [vmem:[%s2394_s11 + $0x2c0] sm:$0xff] %vm1552_vm1, %v1512_v43  ;;  %v1449_v48 = vmax.f32 %v1013_v44, 0.0  ;;  %v1513_v49 = vmax.f32 %v1269_v45, 0.0 }
 0x12c   : > { %1580 = vst.msk [vmem:[%s2394_s11 + $0xd8] sm:$0xff] %vm1552_vm1, %v1451_v46  ;;  %1644 = vst.msk [vmem:[%s2394_s11 + $0x2d8] sm:$0xff] %vm1552_vm1, %v1515_v47 }
 0x12d   : > { %1578 = vst.msk [vmem:[%s2394_s11 + $0xc8] sm:$0xff] %vm1552_vm1, %v1449_v48  ;;  %1642 = vst.msk [vmem:[%s2394_s11 + $0x2c8] sm:$0xff] %vm1552_vm1, %v1513_v49  ;;  %v1999_v50 = vpop.f32.mrb[28].mxu0  ;;  %v2063_v51 = vpop.f32.mrb[28].mxu1 }
 0x12e   : > { %v1034_v52 = vadd.f32 %v1999_v50, %v2386_v7  ;;  %v1290_v53 = vadd.f32 %v2063_v51, %v2386_v7  ;;  %v1025_v54 = vpop.f32.mrb[29].mxu0  ;;  %v1281_v55 = vpop.f32.mrb[29].mxu1 }
 0x12f   : > { %v1026_v56 = vadd.f32 %v2386_v7, %v1025_v54  ;;  %v1282_v57 = vadd.f32 %v2386_v7, %v1281_v55  ;;  %v2000_v58 = vpop.f32.mrb[30].mxu0  ;;  %v2064_v59 = vpop.f32.mrb[30].mxu1 }
 0x130   : > { %v1454_v60 = vmax.f32 %v1034_v52, 0.0  ;;  %v1518_v61 = vmax.f32 %v1290_v53, 0.0  ;;  %v1037_v62 = vadd.f32 %v2000_v58, %v2386_v7  ;;  %v1293_v63 = vadd.f32 %v2064_v59, %v2386_v7  ;;  %v1028_v0 = vpop.f32.mrb[31].mxu0  ;;  %v1284_v1 = vpop.f32.mrb[31].mxu1 }
 0x131   : > { %v1452_v2 = vmax.f32 %v1026_v56, 0.0  ;;  %v1516_v3 = vmax.f32 %v1282_v57, 0.0  ;;  %v1029_v4 = vadd.f32 %v2386_v7, %v1028_v0  ;;  %v1285_v5 = vadd.f32 %v2386_v7, %v1284_v1 }
 0x132   : > { %1583 = vst.msk [vmem:[%s2394_s11 + $0xf0] sm:$0xff] %vm1552_vm1, %v1454_v60  ;;  %1647 = vst.msk [vmem:[%s2394_s11 + $0x2f0] sm:$0xff] %vm1552_vm1, %v1518_v61  ;;  %v1455_v6 = vmax.f32 %v1037_v62, 0.0  ;;  %v1519_v8 = vmax.f32 %v1293_v63, 0.0 }
 0x133   : > { %1581 = vst.msk [vmem:[%s2394_s11 + $0xe0] sm:$0xff] %vm1552_vm1, %v1452_v2  ;;  %1645 = vst.msk [vmem:[%s2394_s11 + $0x2e0] sm:$0xff] %vm1552_vm1, %v1516_v3  ;;  %v1453_v9 = vmax.f32 %v1029_v4, 0.0  ;;  %v1517_v10 = vmax.f32 %v1285_v5, 0.0 }
 0x134   : > { %1584 = vst.msk [vmem:[%s2394_s11 + $0xf8] sm:$0xff] %vm1552_vm1, %v1455_v6  ;;  %1648 = vst.msk [vmem:[%s2394_s11 + $0x2f8] sm:$0xff] %vm1552_vm1, %v1519_v8 }
 0x135   : > { %1582 = vst.msk [vmem:[%s2394_s11 + $0xe8] sm:$0xff] %vm1552_vm1, %v1453_v9  ;;  %1646 = vst.msk [vmem:[%s2394_s11 + $0x2e8] sm:$0xff] %vm1552_vm1, %v1517_v10  ;;  %v2003_v11 = vpop.f32.mrb[32].mxu0  ;;  %v2067_v12 = vpop.f32.mrb[32].mxu1 }
 0x136   : > { %v1050_v13 = vadd.f32 %v2003_v11, %v2386_v7  ;;  %v1306_v14 = vadd.f32 %v2067_v12, %v2386_v7  ;;  %v1041_v15 = vpop.f32.mrb[33].mxu0  ;;  %v1297_v16 = vpop.f32.mrb[33].mxu1 }
 0x137   : > { %v1042_v17 = vadd.f32 %v2386_v7, %v1041_v15  ;;  %v1298_v18 = vadd.f32 %v2386_v7, %v1297_v16  ;;  %v2004_v19 = vpop.f32.mrb[34].mxu0  ;;  %v2068_v20 = vpop.f32.mrb[34].mxu1 }
 0x138   : > { %v1458_v21 = vmax.f32 %v1050_v13, 0.0  ;;  %v1522_v22 = vmax.f32 %v1306_v14, 0.0  ;;  %v1053_v23 = vadd.f32 %v2004_v19, %v2386_v7  ;;  %v1309_v24 = vadd.f32 %v2068_v20, %v2386_v7  ;;  %v1044_v25 = vpop.f32.mrb[35].mxu0  ;;  %v1300_v26 = vpop.f32.mrb[35].mxu1 }
 0x139   : > { %v1456_v27 = vmax.f32 %v1042_v17, 0.0  ;;  %v1520_v28 = vmax.f32 %v1298_v18, 0.0  ;;  %v1045_v29 = vadd.f32 %v2386_v7, %v1044_v25  ;;  %v1301_v30 = vadd.f32 %v2386_v7, %v1300_v26 }
 0x13a   : > { %1587 = vst.msk [vmem:[%s2394_s11 + $0x110] sm:$0xff] %vm1552_vm1, %v1458_v21  ;;  %1651 = vst.msk [vmem:[%s2394_s11 + $0x310] sm:$0xff] %vm1552_vm1, %v1522_v22  ;;  %v1459_v31 = vmax.f32 %v1053_v23, 0.0  ;;  %v1523_v32 = vmax.f32 %v1309_v24, 0.0 }
 0x13b   : > { %1585 = vst.msk [vmem:[%s2394_s11 + $0x100] sm:$0xff] %vm1552_vm1, %v1456_v27  ;;  %1649 = vst.msk [vmem:[%s2394_s11 + $0x300] sm:$0xff] %vm1552_vm1, %v1520_v28  ;;  %v1457_v33 = vmax.f32 %v1045_v29, 0.0  ;;  %v1521_v34 = vmax.f32 %v1301_v30, 0.0 }
 0x13c   : > { %1588 = vst.msk [vmem:[%s2394_s11 + $0x118] sm:$0xff] %vm1552_vm1, %v1459_v31  ;;  %1652 = vst.msk [vmem:[%s2394_s11 + $0x318] sm:$0xff] %vm1552_vm1, %v1523_v32 }
 0x13d   : > { %1586 = vst.msk [vmem:[%s2394_s11 + $0x108] sm:$0xff] %vm1552_vm1, %v1457_v33  ;;  %1650 = vst.msk [vmem:[%s2394_s11 + $0x308] sm:$0xff] %vm1552_vm1, %v1521_v34  ;;  %v2007_v35 = vpop.f32.mrb[36].mxu0  ;;  %v2071_v36 = vpop.f32.mrb[36].mxu1 }
 0x13e   : > { %v1066_v37 = vadd.f32 %v2007_v35, %v2386_v7  ;;  %v1322_v38 = vadd.f32 %v2071_v36, %v2386_v7  ;;  %v1057_v39 = vpop.f32.mrb[37].mxu0  ;;  %v1313_v40 = vpop.f32.mrb[37].mxu1 }
 0x13f   : > { %v1058_v41 = vadd.f32 %v2386_v7, %v1057_v39  ;;  %v1314_v42 = vadd.f32 %v2386_v7, %v1313_v40  ;;  %v2008_v43 = vpop.f32.mrb[38].mxu0  ;;  %v2072_v44 = vpop.f32.mrb[38].mxu1 }
 0x140   : > { %v1462_v45 = vmax.f32 %v1066_v37, 0.0  ;;  %v1526_v46 = vmax.f32 %v1322_v38, 0.0  ;;  %v1069_v47 = vadd.f32 %v2008_v43, %v2386_v7  ;;  %v1325_v48 = vadd.f32 %v2072_v44, %v2386_v7  ;;  %v1060_v49 = vpop.f32.mrb[39].mxu0  ;;  %v1316_v50 = vpop.f32.mrb[39].mxu1 }
 0x141   : > { %v1460_v51 = vmax.f32 %v1058_v41, 0.0  ;;  %v1524_v52 = vmax.f32 %v1314_v42, 0.0  ;;  %v1061_v53 = vadd.f32 %v2386_v7, %v1060_v49  ;;  %v1317_v54 = vadd.f32 %v2386_v7, %v1316_v50 }
 0x142   : > { %1591 = vst.msk [vmem:[%s2394_s11 + $0x130] sm:$0xff] %vm1552_vm1, %v1462_v45  ;;  %1655 = vst.msk [vmem:[%s2394_s11 + $0x330] sm:$0xff] %vm1552_vm1, %v1526_v46  ;;  %v1463_v55 = vmax.f32 %v1069_v47, 0.0  ;;  %v1527_v56 = vmax.f32 %v1325_v48, 0.0 }
 0x143   : > { %1589 = vst.msk [vmem:[%s2394_s11 + $0x120] sm:$0xff] %vm1552_vm1, %v1460_v51  ;;  %1653 = vst.msk [vmem:[%s2394_s11 + $0x320] sm:$0xff] %vm1552_vm1, %v1524_v52  ;;  %v1461_v57 = vmax.f32 %v1061_v53, 0.0  ;;  %v1525_v58 = vmax.f32 %v1317_v54, 0.0 }
 0x144   : > { %1592 = vst.msk [vmem:[%s2394_s11 + $0x138] sm:$0xff] %vm1552_vm1, %v1463_v55  ;;  %1656 = vst.msk [vmem:[%s2394_s11 + $0x338] sm:$0xff] %vm1552_vm1, %v1527_v56 }
 0x145   : > { %1590 = vst.msk [vmem:[%s2394_s11 + $0x128] sm:$0xff] %vm1552_vm1, %v1461_v57  ;;  %1654 = vst.msk [vmem:[%s2394_s11 + $0x328] sm:$0xff] %vm1552_vm1, %v1525_v58  ;;  %v2011_v59 = vpop.f32.mrb[40].mxu0  ;;  %v2075_v60 = vpop.f32.mrb[40].mxu1 }
 0x146   : > { %v1082_v61 = vadd.f32 %v2011_v59, %v2386_v7  ;;  %v1338_v62 = vadd.f32 %v2075_v60, %v2386_v7  ;;  %v1073_v63 = vpop.f32.mrb[41].mxu0  ;;  %v1329_v0 = vpop.f32.mrb[41].mxu1 }
 0x147   : > { %v1074_v1 = vadd.f32 %v2386_v7, %v1073_v63  ;;  %v1330_v2 = vadd.f32 %v2386_v7, %v1329_v0  ;;  %v2012_v3 = vpop.f32.mrb[42].mxu0  ;;  %v2076_v4 = vpop.f32.mrb[42].mxu1 }
 0x148   : > { %v1466_v5 = vmax.f32 %v1082_v61, 0.0  ;;  %v1530_v6 = vmax.f32 %v1338_v62, 0.0  ;;  %v1085_v8 = vadd.f32 %v2012_v3, %v2386_v7  ;;  %v1341_v9 = vadd.f32 %v2076_v4, %v2386_v7  ;;  %v1076_v10 = vpop.f32.mrb[43].mxu0  ;;  %v1332_v11 = vpop.f32.mrb[43].mxu1 }
 0x149   : > { %v1464_v12 = vmax.f32 %v1074_v1, 0.0  ;;  %v1528_v13 = vmax.f32 %v1330_v2, 0.0  ;;  %v1077_v14 = vadd.f32 %v2386_v7, %v1076_v10  ;;  %v1333_v15 = vadd.f32 %v2386_v7, %v1332_v11 }
 0x14a   : > { %1595 = vst.msk [vmem:[%s2394_s11 + $0x150] sm:$0xff] %vm1552_vm1, %v1466_v5  ;;  %1659 = vst.msk [vmem:[%s2394_s11 + $0x350] sm:$0xff] %vm1552_vm1, %v1530_v6  ;;  %v1467_v16 = vmax.f32 %v1085_v8, 0.0  ;;  %v1531_v17 = vmax.f32 %v1341_v9, 0.0 }
 0x14b   : > { %1593 = vst.msk [vmem:[%s2394_s11 + $0x140] sm:$0xff] %vm1552_vm1, %v1464_v12  ;;  %1657 = vst.msk [vmem:[%s2394_s11 + $0x340] sm:$0xff] %vm1552_vm1, %v1528_v13  ;;  %v1465_v18 = vmax.f32 %v1077_v14, 0.0  ;;  %v1529_v19 = vmax.f32 %v1333_v15, 0.0 }
 0x14c   : > { %1596 = vst.msk [vmem:[%s2394_s11 + $0x158] sm:$0xff] %vm1552_vm1, %v1467_v16  ;;  %1660 = vst.msk [vmem:[%s2394_s11 + $0x358] sm:$0xff] %vm1552_vm1, %v1531_v17 }
 0x14d   : > { %1594 = vst.msk [vmem:[%s2394_s11 + $0x148] sm:$0xff] %vm1552_vm1, %v1465_v18  ;;  %1658 = vst.msk [vmem:[%s2394_s11 + $0x348] sm:$0xff] %vm1552_vm1, %v1529_v19  ;;  %v2015_v20 = vpop.f32.mrb[44].mxu0  ;;  %v2079_v21 = vpop.f32.mrb[44].mxu1 }
 0x14e   : > { %v1098_v22 = vadd.f32 %v2015_v20, %v2386_v7  ;;  %v1354_v23 = vadd.f32 %v2079_v21, %v2386_v7  ;;  %v1089_v24 = vpop.f32.mrb[45].mxu0  ;;  %v1345_v25 = vpop.f32.mrb[45].mxu1 }
 0x14f   : > { %v1090_v26 = vadd.f32 %v2386_v7, %v1089_v24  ;;  %v1346_v27 = vadd.f32 %v2386_v7, %v1345_v25  ;;  %v2016_v28 = vpop.f32.mrb[46].mxu0  ;;  %v2080_v29 = vpop.f32.mrb[46].mxu1 }
 0x150   : > { %v1470_v30 = vmax.f32 %v1098_v22, 0.0  ;;  %v1534_v31 = vmax.f32 %v1354_v23, 0.0  ;;  %v1101_v32 = vadd.f32 %v2016_v28, %v2386_v7  ;;  %v1357_v33 = vadd.f32 %v2080_v29, %v2386_v7  ;;  %v1092_v34 = vpop.f32.mrb[47].mxu0  ;;  %v1348_v35 = vpop.f32.mrb[47].mxu1 }
 0x151   : > { %v1468_v36 = vmax.f32 %v1090_v26, 0.0  ;;  %v1532_v37 = vmax.f32 %v1346_v27, 0.0  ;;  %v1093_v38 = vadd.f32 %v2386_v7, %v1092_v34  ;;  %v1349_v39 = vadd.f32 %v2386_v7, %v1348_v35 }
 0x152   : > { %1599 = vst.msk [vmem:[%s2394_s11 + $0x170] sm:$0xff] %vm1552_vm1, %v1470_v30  ;;  %1663 = vst.msk [vmem:[%s2394_s11 + $0x370] sm:$0xff] %vm1552_vm1, %v1534_v31  ;;  %v1471_v40 = vmax.f32 %v1101_v32, 0.0  ;;  %v1535_v41 = vmax.f32 %v1357_v33, 0.0 }
 0x153   : > { %1597 = vst.msk [vmem:[%s2394_s11 + $0x160] sm:$0xff] %vm1552_vm1, %v1468_v36  ;;  %1661 = vst.msk [vmem:[%s2394_s11 + $0x360] sm:$0xff] %vm1552_vm1, %v1532_v37  ;;  %v1469_v42 = vmax.f32 %v1093_v38, 0.0  ;;  %v1533_v43 = vmax.f32 %v1349_v39, 0.0 }
 0x154   : > { %1600 = vst.msk [vmem:[%s2394_s11 + $0x178] sm:$0xff] %vm1552_vm1, %v1471_v40  ;;  %1664 = vst.msk [vmem:[%s2394_s11 + $0x378] sm:$0xff] %vm1552_vm1, %v1535_v41 }
 0x155   : > { %1598 = vst.msk [vmem:[%s2394_s11 + $0x168] sm:$0xff] %vm1552_vm1, %v1469_v42  ;;  %1662 = vst.msk [vmem:[%s2394_s11 + $0x368] sm:$0xff] %vm1552_vm1, %v1533_v43  ;;  %v2019_v44 = vpop.f32.mrb[48].mxu0  ;;  %v2083_v45 = vpop.f32.mrb[48].mxu1 }
 0x156   : > { %v1114_v46 = vadd.f32 %v2019_v44, %v2386_v7  ;;  %v1370_v47 = vadd.f32 %v2083_v45, %v2386_v7  ;;  %v1105_v48 = vpop.f32.mrb[49].mxu0  ;;  %v1361_v49 = vpop.f32.mrb[49].mxu1 }
 0x157   : > { %v1106_v50 = vadd.f32 %v2386_v7, %v1105_v48  ;;  %v1362_v51 = vadd.f32 %v2386_v7, %v1361_v49  ;;  %v2020_v52 = vpop.f32.mrb[50].mxu0  ;;  %v2084_v53 = vpop.f32.mrb[50].mxu1 }
 0x158   : > { %v1474_v54 = vmax.f32 %v1114_v46, 0.0  ;;  %v1538_v55 = vmax.f32 %v1370_v47, 0.0  ;;  %v1117_v56 = vadd.f32 %v2020_v52, %v2386_v7  ;;  %v1373_v57 = vadd.f32 %v2084_v53, %v2386_v7  ;;  %v1108_v58 = vpop.f32.mrb[51].mxu0  ;;  %v1364_v59 = vpop.f32.mrb[51].mxu1 }
 0x159   : > { %v1472_v60 = vmax.f32 %v1106_v50, 0.0  ;;  %v1536_v61 = vmax.f32 %v1362_v51, 0.0  ;;  %v1109_v62 = vadd.f32 %v2386_v7, %v1108_v58  ;;  %v1365_v63 = vadd.f32 %v2386_v7, %v1364_v59 }
 0x15a   : > { %1603 = vst.msk [vmem:[%s2394_s11 + $0x190] sm:$0xff] %vm1552_vm1, %v1474_v54  ;;  %1667 = vst.msk [vmem:[%s2394_s11 + $0x390] sm:$0xff] %vm1552_vm1, %v1538_v55  ;;  %v1475_v0 = vmax.f32 %v1117_v56, 0.0  ;;  %v1539_v1 = vmax.f32 %v1373_v57, 0.0 }
 0x15b   : > { %1601 = vst.msk [vmem:[%s2394_s11 + $0x180] sm:$0xff] %vm1552_vm1, %v1472_v60  ;;  %1665 = vst.msk [vmem:[%s2394_s11 + $0x380] sm:$0xff] %vm1552_vm1, %v1536_v61  ;;  %v1473_v2 = vmax.f32 %v1109_v62, 0.0  ;;  %v1537_v3 = vmax.f32 %v1365_v63, 0.0 }
 0x15c   : > { %1604 = vst.msk [vmem:[%s2394_s11 + $0x198] sm:$0xff] %vm1552_vm1, %v1475_v0  ;;  %1668 = vst.msk [vmem:[%s2394_s11 + $0x398] sm:$0xff] %vm1552_vm1, %v1539_v1 }
 0x15d   : > { %1602 = vst.msk [vmem:[%s2394_s11 + $0x188] sm:$0xff] %vm1552_vm1, %v1473_v2  ;;  %1666 = vst.msk [vmem:[%s2394_s11 + $0x388] sm:$0xff] %vm1552_vm1, %v1537_v3  ;;  %v2023_v4 = vpop.f32.mrb[52].mxu0  ;;  %v2087_v5 = vpop.f32.mrb[52].mxu1 }
 0x15e   : > { %v1130_v6 = vadd.f32 %v2023_v4, %v2386_v7  ;;  %v1386_v8 = vadd.f32 %v2087_v5, %v2386_v7  ;;  %v1121_v9 = vpop.f32.mrb[53].mxu0  ;;  %v1377_v10 = vpop.f32.mrb[53].mxu1 }
 0x15f   : > { %v1122_v11 = vadd.f32 %v2386_v7, %v1121_v9  ;;  %v1378_v12 = vadd.f32 %v2386_v7, %v1377_v10  ;;  %v2024_v13 = vpop.f32.mrb[54].mxu0  ;;  %v2088_v14 = vpop.f32.mrb[54].mxu1 }
 0x160   : > { %v1478_v15 = vmax.f32 %v1130_v6, 0.0  ;;  %v1542_v16 = vmax.f32 %v1386_v8, 0.0  ;;  %v1133_v17 = vadd.f32 %v2024_v13, %v2386_v7  ;;  %v1389_v18 = vadd.f32 %v2088_v14, %v2386_v7  ;;  %v1124_v19 = vpop.f32.mrb[55].mxu0  ;;  %v1380_v20 = vpop.f32.mrb[55].mxu1 }
 0x161   : > { %v1476_v21 = vmax.f32 %v1122_v11, 0.0  ;;  %v1540_v22 = vmax.f32 %v1378_v12, 0.0  ;;  %v1125_v23 = vadd.f32 %v2386_v7, %v1124_v19  ;;  %v1381_v24 = vadd.f32 %v2386_v7, %v1380_v20 }
 0x162   : > { %1607 = vst.msk [vmem:[%s2394_s11 + $0x1b0] sm:$0xff] %vm1552_vm1, %v1478_v15  ;;  %1671 = vst.msk [vmem:[%s2394_s11 + $0x3b0] sm:$0xff] %vm1552_vm1, %v1542_v16  ;;  %v1479_v25 = vmax.f32 %v1133_v17, 0.0  ;;  %v1543_v26 = vmax.f32 %v1389_v18, 0.0 }
 0x163   : > { %1605 = vst.msk [vmem:[%s2394_s11 + $0x1a0] sm:$0xff] %vm1552_vm1, %v1476_v21  ;;  %1669 = vst.msk [vmem:[%s2394_s11 + $0x3a0] sm:$0xff] %vm1552_vm1, %v1540_v22  ;;  %v1477_v27 = vmax.f32 %v1125_v23, 0.0  ;;  %v1541_v28 = vmax.f32 %v1381_v24, 0.0 }
 0x164   : > { %1608 = vst.msk [vmem:[%s2394_s11 + $0x1b8] sm:$0xff] %vm1552_vm1, %v1479_v25  ;;  %1672 = vst.msk [vmem:[%s2394_s11 + $0x3b8] sm:$0xff] %vm1552_vm1, %v1543_v26 }
 0x165   : > { %1606 = vst.msk [vmem:[%s2394_s11 + $0x1a8] sm:$0xff] %vm1552_vm1, %v1477_v27  ;;  %1670 = vst.msk [vmem:[%s2394_s11 + $0x3a8] sm:$0xff] %vm1552_vm1, %v1541_v28  ;;  %v2027_v29 = vpop.f32.mrb[56].mxu0  ;;  %v2091_v30 = vpop.f32.mrb[56].mxu1 }
 0x166   : > { %v1146_v31 = vadd.f32 %v2027_v29, %v2386_v7  ;;  %v1402_v32 = vadd.f32 %v2091_v30, %v2386_v7  ;;  %v1137_v33 = vpop.f32.mrb[57].mxu0  ;;  %v1393_v34 = vpop.f32.mrb[57].mxu1 }
 0x167   : > { %v1138_v35 = vadd.f32 %v2386_v7, %v1137_v33  ;;  %v1394_v36 = vadd.f32 %v2386_v7, %v1393_v34  ;;  %v2028_v37 = vpop.f32.mrb[58].mxu0  ;;  %v2092_v38 = vpop.f32.mrb[58].mxu1 }
 0x168   : > { %v1482_v39 = vmax.f32 %v1146_v31, 0.0  ;;  %v1546_v40 = vmax.f32 %v1402_v32, 0.0  ;;  %v1149_v41 = vadd.f32 %v2028_v37, %v2386_v7  ;;  %v1405_v42 = vadd.f32 %v2092_v38, %v2386_v7  ;;  %v1140_v43 = vpop.f32.mrb[59].mxu0  ;;  %v1396_v44 = vpop.f32.mrb[59].mxu1 }
 0x169   : > { %v1480_v45 = vmax.f32 %v1138_v35, 0.0  ;;  %v1544_v46 = vmax.f32 %v1394_v36, 0.0  ;;  %v1141_v47 = vadd.f32 %v2386_v7, %v1140_v43  ;;  %v1397_v48 = vadd.f32 %v2386_v7, %v1396_v44 }
 0x16a   : > { %1611 = vst.msk [vmem:[%s2394_s11 + $0x1d0] sm:$0xff] %vm1552_vm1, %v1482_v39  ;;  %1675 = vst.msk [vmem:[%s2394_s11 + $0x3d0] sm:$0xff] %vm1552_vm1, %v1546_v40  ;;  %v1483_v49 = vmax.f32 %v1149_v41, 0.0  ;;  %v1547_v50 = vmax.f32 %v1405_v42, 0.0 }
 0x16b   : > { %1609 = vst.msk [vmem:[%s2394_s11 + $0x1c0] sm:$0xff] %vm1552_vm1, %v1480_v45  ;;  %1673 = vst.msk [vmem:[%s2394_s11 + $0x3c0] sm:$0xff] %vm1552_vm1, %v1544_v46  ;;  %v1481_v51 = vmax.f32 %v1141_v47, 0.0  ;;  %v1545_v52 = vmax.f32 %v1397_v48, 0.0 }
 0x16c   : > { %1612 = vst.msk [vmem:[%s2394_s11 + $0x1d8] sm:$0xff] %vm1552_vm1, %v1483_v49  ;;  %1676 = vst.msk [vmem:[%s2394_s11 + $0x3d8] sm:$0xff] %vm1552_vm1, %v1547_v50 }
 0x16d   : > { %1610 = vst.msk [vmem:[%s2394_s11 + $0x1c8] sm:$0xff] %vm1552_vm1, %v1481_v51  ;;  %1674 = vst.msk [vmem:[%s2394_s11 + $0x3c8] sm:$0xff] %vm1552_vm1, %v1545_v52  ;;  %v2031_v53 = vpop.f32.mrb[60].mxu0  ;;  %v2095_v54 = vpop.f32.mrb[60].mxu1 }
 0x16e   : > { %v1162_v55 = vadd.f32 %v2031_v53, %v2386_v7  ;;  %v1418_v56 = vadd.f32 %v2095_v54, %v2386_v7  ;;  %v1153_v57 = vpop.f32.mrb[61].mxu0  ;;  %v1409_v58 = vpop.f32.mrb[61].mxu1 }
 0x16f   : > { %v1154_v59 = vadd.f32 %v2386_v7, %v1153_v57  ;;  %v1410_v60 = vadd.f32 %v2386_v7, %v1409_v58  ;;  %v2032_v61 = vpop.f32.mrb[62].mxu0  ;;  %v2096_v62 = vpop.f32.mrb[62].mxu1 }
 0x170   : > { %v1486_v63 = vmax.f32 %v1162_v55, 0.0  ;;  %v1550_v0 = vmax.f32 %v1418_v56, 0.0  ;;  %v1165_v1 = vadd.f32 %v2032_v61, %v2386_v7  ;;  %v1421_v2 = vadd.f32 %v2096_v62, %v2386_v7  ;;  %v1156_v3 = vpop.f32.mrb[63].mxu0  ;;  %v1412_v4 = vpop.f32.mrb[63].mxu1 }
 0x171   : > { %v1484_v5 = vmax.f32 %v1154_v59, 0.0  ;;  %v1548_v6 = vmax.f32 %v1410_v60, 0.0  ;;  %v1157_v8 = vadd.f32 %v2386_v7, %v1156_v3  ;;  %v1413_v9 = vadd.f32 %v2386_v7, %v1412_v4 }
 0x172   : > { %1615 = vst.msk [vmem:[%s2394_s11 + $0x1f0] sm:$0xff] %vm1552_vm1, %v1486_v63  ;;  %1679 = vst.msk [vmem:[%s2394_s11 + $0x3f0] sm:$0xff] %vm1552_vm1, %v1550_v0  ;;  %v1487_v10 = vmax.f32 %v1165_v1, 0.0  ;;  %v1551_v11 = vmax.f32 %v1421_v2, 0.0 }
 0x173   : > { %1613 = vst.msk [vmem:[%s2394_s11 + $0x1e0] sm:$0xff] %vm1552_vm1, %v1484_v5  ;;  %1677 = vst.msk [vmem:[%s2394_s11 + $0x3e0] sm:$0xff] %vm1552_vm1, %v1548_v6  ;;  %v1485_v12 = vmax.f32 %v1157_v8, 0.0  ;;  %v1549_v13 = vmax.f32 %v1413_v9, 0.0 }
 0x174   : > { %1616 = vst.msk [vmem:[%s2394_s11 + $0x1f8] sm:$0xff] %vm1552_vm1, %v1487_v10  ;;  %1680 = vst.msk [vmem:[%s2394_s11 + $0x3f8] sm:$0xff] %vm1552_vm1, %v1551_v11 }
 0x175   : > { %1614 = vst.msk [vmem:[%s2394_s11 + $0x1e8] sm:$0xff] %vm1552_vm1, %v1485_v12  ;;  %1678 = vst.msk [vmem:[%s2394_s11 + $0x3e8] sm:$0xff] %vm1552_vm1, %v1549_v13 }
 0x176 PF: > { %s13_s12 = sadd.s32 1, %s2196_s12  }
 0x177   : > { %p10_p4 = scmp.ge.s32.totalorder %s13_s12, 4  }
 0x179   :  { %12 = sbr.rel (!%p10_p4) target bundleno = 1 (0x1), region = 62 }

</bundles_post_ra>
